<compile_context>
chip_gen: v7x
topology: tpu7x:2x2x1
jax: 0.10.0
libtpu: 0.0.40
codegen_flags: <defaults>
</compile_context>

<pallas_src>
import functools

import jax
import jax.numpy as jnp
from jax import lax
from jax.experimental import pallas as pl
from jax.experimental.pallas import tpu as pltpu


def _cdiv(a, b):
    return (a + b - 1) // b


def _round_up(x, m):
    return _cdiv(x, m) * m


def _choose_tile(n, t_max, align):
    """Padding-aware tile choice: pick the grid count first, then the smallest
    `align`-aligned tile that covers `n` with that many blocks."""
    if n <= t_max:
        return n, 1                  # single full-extent block; no alignment needed
    g = _cdiv(n, t_max)
    t = _round_up(_cdiv(n, g), align)
    g = _cdiv(n, t)
    return t, g


def _vmem_need_bytes(tm, tn, d, in_itemsize):
    # Double-buffered o1/o2 tiles + tiny label/validity vectors + output block
    # + full-tile f32 epilogue temporaries (sim + selects).
    tiles = 2 * (tm + tn) * d * in_itemsize
    small = 2 * 2 * (tm + tn) * 4
    outb = 2 * 128 * 4
    epi = 4 * tm * tn * 4
    return tiles + small + outb + epi


def _mcl_kernel(o1_ref, o2_ref, l1_ref, l2_ref, rv_ref, cv_ref, out_ref, *,
                margin, use_mask):
    # Full-K dot on the MXU: [tm, d] x [tn, d] contracted over d -> [tm, tn],
    # accumulated in f32.  Single K step => no accumulator scratch, no
    # read-modify-write, no init/finalize phases.
    sim = lax.dot_general(
        o1_ref[...], o2_ref[...],
        dimension_numbers=(((1,), (1,)), ((), ())),
        preferred_element_type=jnp.float32)

    pos = l1_ref[...] == l2_ref[...]                 # (tm,1)==(1,tn) -> (tm,tn)
    diff = sim - jnp.float32(margin)
    # pos pairs: (sim - margin)^2 ; neg pairs: max(margin - sim, 0) = max(-diff, 0)
    terms = jnp.where(pos, diff * diff, jnp.maximum(-diff, 0.0))

    if use_mask:
        # Edge blocks overhang the true N1/N2 extents (their rows/cols hold
        # uninitialized data); zero those entries with a select (not a mul, so
        # NaN/Inf garbage cannot leak into the sum).
        valid = (rv_ref[...] > 0) & (cv_ref[...] > 0)  # (tm,1)&(1,tn) -> (tm,tn)
        terms = jnp.where(valid, terms, 0.0)

    partial = jnp.sum(terms)
    out_ref[...] = jnp.broadcast_to(partial, (1, 1, 1, 128)).astype(jnp.float32)


def multi_contrastive_loss(output1, output2, label1, label2, margin=2.0, *,
                           tm_max=512, tn_max=512,
                           vmem_budget_bytes=40 * 1024 * 1024,
                           cast_inputs_to_bf16=False):
    """Pallas implementation of MultiContrastiveLoss.forward.

    output1: [N1, D] float (f32 or bf16)
    output2: [N2, D] float (f32 or bf16)
    label1:  [N1]    integer labels
    label2:  [N2]    integer labels
    returns: scalar float32 loss

    On v6e (128 MiB VMEM, worst FLOP:BW ratio) callers may pass
    tm_max=tn_max=1024..2048 and a larger vmem_budget_bytes; the defaults are
    sized to stay comfortably inside v7x's 64 MiB VMEM.
    """
    n1, d = output1.shape
    n2, d2 = output2.shape
    assert d == d2, "feature dims must match"

    if cast_inputs_to_bf16 and output1.dtype == jnp.float32:
        # Optional: ~3x MXU throughput and half the HBM traffic (accuracy
        # trade-off left to the caller; accumulation stays f32).
        output1 = output1.astype(jnp.bfloat16)
        output2 = output2.astype(jnp.bfloat16)
    itemsize = jnp.dtype(output1.dtype).itemsize

    # K: one full-extent step.  Zero-pad the feature axis only when it is not
    # lane-aligned (zeros contribute nothing to the dot); aligned inputs skip
    # the HBM round trip entirely.
    d_k = _round_up(d, 128)
    if d_k != d:
        output1 = jnp.pad(output1, ((0, 0), (0, d_k - d)))
        output2 = jnp.pad(output2, ((0, 0), (0, d_k - d)))

    # Padding-aware M/N tiles, shrunk (largest side first) to fit the VMEM
    # budget with double buffering + epilogue temporaries.
    tmx, tnx = tm_max, tn_max
    while True:
        tm, gm = _choose_tile(n1, tmx, 8)
        tn, gn = _choose_tile(n2, tnx, 128)
        need = _vmem_need_bytes(tm, tn, d_k, itemsize)
        if need <= vmem_budget_bytes:
            break
        if tmx >= tnx and tmx > 8:
            tmx = max(8, tmx // 2)
        elif tnx > 128:
            tnx = max(128, tnx // 2)
        elif tmx > 8:
            tmx = max(8, tmx // 2)
        else:
            # TODO(synk): add a K-grid accumulator fallback for feature dims
            # too large for a single-K VMEM tile.
            raise ValueError("feature dim too large for single-K VMEM tiling")

    m_cov, n_cov = gm * tm, gn * tn
    use_mask = (m_cov != n1) or (n_cov != n2)

    l1 = label1.astype(jnp.int32).reshape(n1, 1)
    l2 = label2.astype(jnp.int32).reshape(1, n2)
    # Tiny per-row / per-col validity vectors (exactly block-aligned, so their
    # own blocks never overhang).
    rv = (jnp.arange(m_cov, dtype=jnp.int32) < n1).astype(jnp.int32).reshape(m_cov, 1)
    cv = (jnp.arange(n_cov, dtype=jnp.int32) < n2).astype(jnp.int32).reshape(1, n_cov)

    kernel = functools.partial(_mcl_kernel, margin=float(margin), use_mask=use_mask)

    vmem_limit = int(min(max(2 * need, 32 * 1024 * 1024), 64 * 1024 * 1024))

    cost = pl.CostEstimate(
        flops=2 * m_cov * n_cov * d_k,
        transcendentals=0,
        bytes_accessed=(gn * n1 + gm * n2) * d_k * itemsize
                       + (n1 + n2 + m_cov + n_cov) * 4
                       + gm * gn * 128 * 4)

    partials = pl.pallas_call(
        kernel,
        out_shape=jax.ShapeDtypeStruct((gm, gn, 1, 128), jnp.float32),
        grid=(gm, gn),
        in_specs=[
            pl.BlockSpec((tm, d_k), lambda i, j: (i, 0)),   # output1 tile (full K)
            pl.BlockSpec((tn, d_k), lambda i, j: (j, 0)),   # output2 tile (full K)
            pl.BlockSpec((tm, 1), lambda i, j: (i, 0)),     # label1 column
            pl.BlockSpec((1, tn), lambda i, j: (0, j)),     # label2 row
            pl.BlockSpec((tm, 1), lambda i, j: (i, 0)),     # row validity
            pl.BlockSpec((1, tn), lambda i, j: (0, j)),     # col validity
        ],
        out_specs=pl.BlockSpec((1, 1, 1, 128), lambda i, j: (i, j, 0, 0)),
        compiler_params=pltpu.CompilerParams(
            dimension_semantics=("parallel", "parallel"),
            vmem_limit_bytes=vmem_limit),
        cost_estimate=cost,
    )(output1, output2, l1, l2, rv, cv)

    # Tiny final reduction + normalization with the true pair count N1*N2.
    return jnp.sum(partials[:, :, 0, 0]) / jnp.float32(n1 * n2)


def _reference_loss(output1, output2, label1, label2, margin=2.0):
    sim = jnp.dot(output1, output2.T, preferred_element_type=jnp.float32,
                  precision=jax.lax.Precision.HIGHEST)
    pos_mask = label1[:, None] == label2[None, :]
    pos = jnp.sum(jnp.where(pos_mask, (sim - margin) ** 2, 0.0))
    neg = jnp.sum(jnp.where(pos_mask, 0.0, jnp.maximum(margin - sim, 0.0)))
    return (pos + neg) / (sim.shape[0] * sim.shape[1])


if __name__ == "__main__":
    key = jax.random.PRNGKey(0)
    k1, k2, k3, k4, k5, k6, k7, k8 = jax.random.split(key, 8)

    # Small case (typical module usage): single (i, j) tile, exact coverage,
    # K padded 32 -> 128 with zeros.
    N1, N2, D = 8, 16, 32
    out1 = jax.random.normal(k1, (N1, D), dtype=jnp.float32)
    out2 = jax.random.normal(k2, (N2, D), dtype=jnp.float32)
    lab1 = jax.random.randint(k3, (N1,), 0, 4, dtype=jnp.int32)
    lab2 = jax.random.randint(k4, (N2,), 0, 4, dtype=jnp.int32)

    loss = jax.block_until_ready(
        multi_contrastive_loss(out1, out2, lab1, lab2, margin=2.0))
    ref = _reference_loss(out1, out2, lab1, lab2, margin=2.0)
    assert jnp.allclose(loss, ref, rtol=1e-4, atol=1e-4), (loss, ref)

    # Multi-tile case with edge overhang in both M and N (forced small tiles to
    # exercise the 3x3 grid + validity masking) and bf16 inputs with f32
    # accumulation; no K padding (640 is lane-aligned).
    M1, M2, D2 = 300, 300, 640
    big1 = jax.random.normal(k5, (M1, D2), dtype=jnp.float32).astype(jnp.bfloat16)
    big2 = jax.random.normal(k6, (M2, D2), dtype=jnp.float32).astype(jnp.bfloat16)
    blab1 = jax.random.randint(k7, (M1,), 0, 5, dtype=jnp.int32)
    blab2 = jax.random.randint(k8, (M2,), 0, 5, dtype=jnp.int32)

    loss2 = jax.block_until_ready(
        multi_contrastive_loss(big1, big2, blab1, blab2, margin=2.0,
                               tm_max=128, tn_max=128))
    ref2 = _reference_loss(big1, big2, blab1, blab2, margin=2.0)
    assert jnp.allclose(loss2, ref2, rtol=1e-3, atol=1e-3), (loss2, ref2)

    print("KERNEL_OK")
</pallas_src>

<mosaic_0001>
module attributes {stable_mosaic.version = 11 : i64} {
  func.func @_mcl_kernel(%arg0: i32, %arg1: i32, %arg2: memref<8x128xf32, #tpu.memory_space<vmem>>, %arg3: memref<16x128xf32, #tpu.memory_space<vmem>>, %arg4: memref<8x1xi32, #tpu.memory_space<vmem>>, %arg5: memref<1x16xi32, #tpu.memory_space<vmem>>, %arg6: memref<8x1xi32, #tpu.memory_space<vmem>>, %arg7: memref<1x16xi32, #tpu.memory_space<vmem>>, %arg8: memref<1x1x1x128xf32, #tpu.memory_space<vmem>>) attributes {dimension_semantics = [#tpu.dimension_semantics<parallel>, #tpu.dimension_semantics<parallel>], iteration_bounds = array<i64: 1, 1>, scalar_prefetch = 0 : i64, scratch_operands = 0 : i64, tpu.core_type = #tpu.core_type<tc>, window_params = [{transform_indices = @transform_0, window_bounds = array<i64: 8, 128>}, {transform_indices = @transform_1, window_bounds = array<i64: 16, 128>}, {transform_indices = @transform_2, window_bounds = array<i64: 8, 1>}, {transform_indices = @transform_3, window_bounds = array<i64: 1, 16>}, {transform_indices = @transform_4, window_bounds = array<i64: 8, 1>}, {transform_indices = @transform_5, window_bounds = array<i64: 1, 16>}, {transform_indices = @transform_6, window_bounds = array<i64: 1, 1, 1, 128>}]} {
    %c0 = arith.constant 0 : index
    %c0_0 = arith.constant 0 : index
    %0 = vector.load %arg2[%c0, %c0_0] : memref<8x128xf32, #tpu.memory_space<vmem>>, vector<8x128xf32>
    %c0_1 = arith.constant 0 : index
    %c0_2 = arith.constant 0 : index
    %1 = vector.load %arg3[%c0_1, %c0_2] : memref<16x128xf32, #tpu.memory_space<vmem>>, vector<16x128xf32>
    %cst = arith.constant dense<0.000000e+00> : vector<8x16xf32>
    %2 = tpu.matmul %0, %1, %cst {dimension_numbers = #tpu.dot_dimension_numbers<[1], [1], [0], [0], [0, 0, 1, 0], [], []>} : vector<8x128xf32>, vector<16x128xf32>, vector<8x16xf32> -> vector<8x16xf32>
    %c0_3 = arith.constant 0 : index
    %c0_4 = arith.constant 0 : index
    %3 = vector.load %arg4[%c0_3, %c0_4] : memref<8x1xi32, #tpu.memory_space<vmem>>, vector<8x1xi32>
    %c0_5 = arith.constant 0 : index
    %c0_6 = arith.constant 0 : index
    %4 = vector.load %arg5[%c0_5, %c0_6] : memref<1x16xi32, #tpu.memory_space<vmem>>, vector<1x16xi32>
    %5 = vector.broadcast %3 : vector<8x1xi32> to vector<8x16xi32>
    %6 = vector.broadcast %4 : vector<1x16xi32> to vector<8x16xi32>
    %7 = arith.cmpi eq, %5, %6 : vector<8x16xi32>
    %cst_7 = arith.constant 2.000000e+00 : f32
    %8 = vector.broadcast %cst_7 : f32 to vector<8x16xf32>
    %9 = arith.subf %2, %8 : vector<8x16xf32>
    %10 = arith.mulf %9, %9 : vector<8x16xf32>
    %cst_8 = arith.constant 0.000000e+00 : f32
    %11 = vector.broadcast %cst_8 : f32 to vector<8x16xf32>
    %12 = arith.subf %11, %9 : vector<8x16xf32>
    %cst_9 = arith.constant 0.000000e+00 : f32
    %13 = vector.broadcast %cst_9 : f32 to vector<8x16xf32>
    %14 = arith.maximumf %12, %13 : vector<8x16xf32>
    %15 = arith.select %7, %10, %14 : vector<8x16xi1>, vector<8x16xf32>
    %16 = vector.shape_cast %15 : vector<8x16xf32> to vector<1x8x16xf32>
    %cst_10 = arith.constant dense<0.000000e+00> : vector<1xf32>
    %17 = vector.multi_reduction <add>, %16, %cst_10 [1, 2] : vector<1x8x16xf32> to vector<1xf32>
    %18 = vector.shape_cast %17 : vector<1xf32> to vector<1x1x1xf32>
    %19 = vector.extract %18[0, 0, 0] : f32 from vector<1x1x1xf32>
    %20 = vector.broadcast %19 : f32 to vector<1x1x1x128xf32>
    %c0_11 = arith.constant 0 : index
    %c0_12 = arith.constant 0 : index
    %c0_13 = arith.constant 0 : index
    %c0_14 = arith.constant 0 : index
    %21 = vector.load %arg8[%c0_11, %c0_12, %c0_13, %c0_14] : memref<1x1x1x128xf32, #tpu.memory_space<vmem>>, vector<1x1x1x128xf32>
    tpu.vector_store %arg8[%c0_11, %c0_12, %c0_13, %c0_14], %20 {strides = array<i32>} : memref<1x1x1x128xf32, #tpu.memory_space<vmem>>, vector<1x1x1x128xf32>,
    return
  }
  func.func @transform_0(%arg0: i32, %arg1: i32) -> (i32, i32) {
    %c0_i32 = arith.constant 0 : i32
    %c0_i32_0 = arith.constant 0 : i32
    return %arg0, %c0_i32 : i32, i32
  }
  func.func @transform_1(%arg0: i32, %arg1: i32) -> (i32, i32) {
    %c0_i32 = arith.constant 0 : i32
    %c0_i32_0 = arith.constant 0 : i32
    return %arg1, %c0_i32 : i32, i32
  }
  func.func @transform_2(%arg0: i32, %arg1: i32) -> (i32, i32) {
    %c0_i32 = arith.constant 0 : i32
    %c0_i32_0 = arith.constant 0 : i32
    return %arg0, %c0_i32 : i32, i32
  }
  func.func @transform_3(%arg0: i32, %arg1: i32) -> (i32, i32) {
    %c0_i32 = arith.constant 0 : i32
    %c0_i32_0 = arith.constant 0 : i32
    return %c0_i32, %arg1 : i32, i32
  }
  func.func @transform_4(%arg0: i32, %arg1: i32) -> (i32, i32) {
    %c0_i32 = arith.constant 0 : i32
    %c0_i32_0 = arith.constant 0 : i32
    return %arg0, %c0_i32 : i32, i32
  }
  func.func @transform_5(%arg0: i32, %arg1: i32) -> (i32, i32) {
    %c0_i32 = arith.constant 0 : i32
    %c0_i32_0 = arith.constant 0 : i32
    return %c0_i32, %arg1 : i32, i32
  }
  func.func @transform_6(%arg0: i32, %arg1: i32) -> (i32, i32, i32, i32) {
    %c0_i32 = arith.constant 0 : i32
    %c0_i32_0 = arith.constant 0 : i32
    %c0_i32_1 = arith.constant 0 : i32
    return %arg0, %arg1, %c0_i32, %c0_i32_0 : i32, i32, i32, i32
  }
}

</mosaic_0001>

<bundles_post_ra>
// kernel: tpu_custom_call.1
= control target key start
LH: loop header
LB: loop body
LE: loop exit
PB: predicated region body
PF: predicated region fallthrough
CT: control target
= control target key end

     0   :  { %11 = vsyncpa [#allocation3], 0  ;;  %s301_s0 = inlined_call_operand.hbm [shape: f32[8,128], index: 0, kind: input, shape index: {}]   ;;  %s302_s1 = inlined_call_operand.vmem [shape: f32[16,128], index: 1, kind: input, shape index: {}]   ;;  %s303_s2 = inlined_call_operand.vmem [shape: s32[8,1], index: 2, kind: input, shape index: {}]   ;;  %s304_s3 = inlined_call_operand.vmem [shape: s32[1,16], index: 3, kind: input, shape index: {}]   ;;  %s305_s4 = inlined_call_operand.vmem [shape: s32[8,1], index: 4, kind: input, shape index: {}]   ;;  %s306_s5 = inlined_call_operand.vmem [shape: s32[1,16], index: 5, kind: input, shape index: {}]   ;;  %s307_s6 = inlined_call_operand.hbm [shape: f32[1,1,1,128], index: 6, kind: output, shape index: {}]  }
   0x1   :  { %12 = vsyncpa [#allocation4], 0  ;;  %s224_s21 = smov [#allocation2]   ;;  %s176_s25 = scalar_lea.hbm %s301_s0, 128 }
   0x2   :  { %s19_s22 = sshll.u32 %s224_s21, 4  ;;  %p177_p0 = scmp.ne.s32.totalorder %s301_s0, %s176_s25  ;;  %s20_s22 = int_to_ptr.vmem [resolvable:$true] %s19_s22 }
   0x3   :  { %p180_p1 = scmp.lt.u32.totalorder %s176_s25, %s301_s0 }
   0x5   :  { %p182_p2 = pnand %p180_p1, %p177_p0 }
   0x7   :  { %185 = shalt.err (!%p182_p2)
}
   0x8   :  { %s186_s5 = scalar_lea.vmem %s20_s22, 128  ;;  %p191_p4 = scmp.lt.s32.totalorder %s20_s22, %s20_s22 }
   0x9   :  { %p187_p3 = scmp.ne.s32.totalorder %s20_s22, %s186_s5  ;;  %p192_p5 = scmp.lt.s32.totalorder %s186_s5, %s186_s5 }
   0xb   :  { %p193_p6 = por %p192_p5, %p191_p4 }
   0xd   :  { %p194_p7 = pnand %p193_p6, %p187_p3 }
   0xf   :  { %197 = shalt.err (!%p194_p7)
}
  0x10   :  { %22 = dma.hbm_to_vmem [thread:$0]  %s301_s0, 128, %s20_s22, [#allocation3]  }
  0x11   :  { %220 = dma.done.wait [#allocation3], 128  }
  0x12   :  { %221 = vsyncadd [#allocation3], 4294967168  ;;  %v225_v0 = vmov 0.0|0.0   ;;  %vm226_vm0 = vmmov 0   ;;  %v227_v1 = vmov 0.0   ;;  %v228_v2 = vmov 0  }
  0x13   :  { %164 = vmatprep.subr.bf16.mxu0 %v225_v0  ;;  %161 = vmatprep.mubr.msk.f32.mxu0 %vm226_vm0, %v227_v1  ;;  %v37_v3 = vld [vmem:[%s302_s1] sm:$0xff]  ;;  %v38_v4 = vld [vmem:[%s302_s1 + $0x8] sm:$0xff]  ;;  %vm124_vm2 = vcmask 130048   ;;  %s229_s1 = smov [#allocation5]  }
  0x14   :  { %175 = vset.pattern.permute.xlu0 %v228_v2  ;;  %v165_v5 = vpack.c.bf16 %v38_v4, %v37_v3  ;;  %v109_v6 = vld [vmem:[%s303_s2] sm:$0xff]  ;;  %s143_s2 = sshll.u32 %s229_s1, 4  ;;  %s144_s2 = int_to_ptr.vmem [resolvable:$true] %s143_s2 }
  0x15   :  { %112 = vperm.xlu0 %175, %v109_v6   ;;  %v36_v7 = vld [vmem:[#allocation2] sm:$0xff]  ;;  %s198_s14 = scalar_lea.vmem %s144_s2, 16  ;;  %s202_s15 = scalar_lea.vmem %s144_s2, 32 }
  0x16   :  { %166 = vmatpush3.bf16.xpose.msra.mxu0 %v165_v5  ;;  %v152_v11 = vld [vmem:[%s304_s3] ss:$0 sm:$0xff]  ;;  %p199_p8 = scmp.ne.s32.totalorder %s144_s2, %s198_s14  ;;  %p203_p9 = scmp.lt.s32.totalorder %s144_s2, %s144_s2 }
  0x17   :  { %p204_p10 = scmp.lt.s32.totalorder %s202_s15, %s198_s14 }
  0x19   :  { %p205_p11 = por %p204_p10, %p203_p9 }
  0x1b   :  { %p206_p12 = pnand %p205_p11, %p199_p8 }
  0x1d   :  { %162 = vmatmul.mubr.f32.vlgmr.msra.gmra.mrb[0].mxu0 %v36_v7 }
  0x94   :  { %v113_v12 = vpop.permute.xlu0 %112 }
  0x95   :  { %vm118_vm1 = vcmp.eq.s32.totalorder %v113_v12, %v152_v11 }
  0xf0   :  { %v105_v8 = vpop.f32.mrb[0].mxu0 }
  0xf1   :  { %v153_v9 = vadd.f32 -2.0, %v105_v8  ;;  %v163_v10 = vpop.f32.mrb[1].mxu0 }
  0xf3   :  { %v121_v13 = vsub.f32 0.0, %v153_v9  ;;  %v120_v14 = vmul.f32 %v153_v9, %v153_v9 }
  0xf5   :  { %v122_v15 = vmax.f32 %v121_v13, 0.0 }
  0xf7   :  { %v123_v16 = vsel %vm118_vm1, %v120_v14, %v122_v15 }
  0xf8   :  { %v125_v17 = vsel %vm124_vm2, %v123_v16, 0.0 }
  0xf9   :  { %126 = vadd.xlane.f32.xlu0 %v125_v17 }
 0x186   :  { %v127_v18 = vpop.xlane.xlu0 %126 }
 0x187   :  { %v128_v19 = vrot.slane %v127_v18, 4 }
 0x189   :  { %v129_v20 = vadd.f32 %v128_v19, %v127_v18 }
 0x18b   :  { %v130_v21 = vrot.slane %v129_v20, 2 }
 0x18d   :  { %v131_v22 = vadd.f32 %v130_v21, %v129_v20 }
 0x18f   :  { %v132_v23 = vrot.slane %v131_v22, 1 }
 0x191   :  { %v133_v24 = vadd.f32 %v132_v23, %v131_v22 }
 0x193   :  { %167 = vpush %v133_v24 }
 0x1c4   :  { %s168_s3 = spop %167 }
 0x1c5   :  { %v135_v25 = vstv %s168_s3 }
 0x1c6   :  { %136 = vst [vmem:[#allocation5] sm:$0x1] %v135_v25 }
 0x1c7   :  { %209 = shalt.err (!%p206_p12)
}
 0x1c8   :  { %s210_s18 = scalar_lea.hbm %s307_s6, 16 }
 0x1c9   :  { %p211_p13 = scmp.ne.s32.totalorder %s307_s6, %s210_s18  ;;  %p214_p0 = scmp.lt.u32.totalorder %s210_s18, %s307_s6 }
 0x1cb   :  { %p216_p1 = pnand %p214_p0, %p211_p13 }
 0x1cd   :  { %219 = shalt.err (!%p216_p1)
}
 0x1ce   :  { %146 = dma.vmem_to_hbm [thread:$0]  %s144_s2, 16, %s307_s6, [#allocation4]  }
 0x1cf   :  { %222 = dma.done.wait [#allocation4], 16  }
 0x1d0   :  { %223 = vsyncadd [#allocation4], 4294967280 }
 0x1d1   :  { %150 = vsyncpa [#allocation3], 1 }
 0x1d2   :  { %151 = vsyncpa [#allocation4], 1 }

</bundles_post_ra>
